<compile_context>
chip_gen: v7x
topology: tpu7x:2x2x1
jax: 0.10.0
libtpu: 0.0.40
codegen_flags: <defaults>
</compile_context>

<pallas_src>
import math
from functools import partial

import jax
import jax.numpy as jnp
import numpy as np
from jax.experimental import pallas as pl
from jax.experimental.pallas import tpu as pltpu

D_MODEL = 32
MAX_SEQ_LEN = 400
B = 2
S = 8


def _build_pe(max_seq_len, d_model):
    """Exact replica of the PyTorch buffer construction (register_buffer 'pe')."""
    pe = np.zeros((max_seq_len, d_model), np.float32)
    for pos in range(max_seq_len):
        for i in range(0, d_model, 2):
            pe[pos, i] = math.sin(pos / 10000 ** (2 * i / d_model))
            pe[pos, i + 1] = math.cos(pos / 10000 ** (2 * (i + 1) / d_model))
    return jnp.asarray(pe)


def make_pe_slab(pe_full, seq_len):
    """Precompute the lane-dense positional-encoding slab once (device-resident)."""
    d_model = pe_full.shape[-1]
    return jnp.reshape(pe_full[:seq_len], (1, seq_len * d_model))


def _pe_add_kernel(x_ref, pe_ref, o_ref, *, scale):
    # x_ref : (B, S*D) (lane-dense) or (B, S, D) fallback
    # pe_ref: (1, S*D)              or (1, S, D)  -> broadcasts over batch rows
    o_ref[...] = x_ref[...] * scale + pe_ref[...]
    # TODO(synk): nn.Dropout(p=0.1) is eval-mode identity here; training-mode
    # dropout would need pltpu.prng_seed/prng_random_bits inside the kernel.


@jax.jit
def positional_encoder(x, pe2d):
    """x: (B, S, D) float32; pe2d: (1, S*D) float32 lane-dense pe slab."""
    Bn, Sn, Dn = x.shape
    scale = math.sqrt(Dn)

    if (Sn * Dn) % 128 == 0:
        # Fast path: lane-dense rows (S*D multiple of 128) -> unmasked vld/vst.
        x_in = x.reshape(Bn, Sn * Dn)
        pe_in = pe2d
        out_shape = jax.ShapeDtypeStruct((Bn, Sn * Dn), x.dtype)
    else:
        # Fallback: full-array 3-D block (correct; stores may be lane-masked).
        x_in = x
        pe_in = pe2d.reshape(1, Sn, Dn)
        out_shape = jax.ShapeDtypeStruct((Bn, Sn, Dn), x.dtype)

    out = pl.pallas_call(
        partial(_pe_add_kernel, scale=scale),
        out_shape=out_shape,
        # No grid: the whole (tiny) problem is one kernel invocation with the
        # full arrays resident in VMEM — no per-grid-step overhead.
        in_specs=[
            pl.BlockSpec(memory_space=pltpu.MemorySpace.VMEM),  # x
            pl.BlockSpec(memory_space=pltpu.MemorySpace.VMEM),  # pe
        ],
        out_specs=pl.BlockSpec(memory_space=pltpu.MemorySpace.VMEM),
        input_output_aliases={0: 0},  # donate x's buffer to the output
    )(x_in, pe_in)
    return out.reshape(Bn, Sn, Dn)


def reference(x, pe_full):
    Bn, Sn, Dn = x.shape
    return x * math.sqrt(Dn) + pe_full[None, :Sn, :]


if __name__ == "__main__":
    key = jax.random.PRNGKey(0)
    x = jax.random.normal(key, (B, S, D_MODEL), jnp.float32)

    # "Module init": constant buffer + lane-dense slab, built once.
    pe_full = _build_pe(MAX_SEQ_LEN, D_MODEL)
    pe2d = make_pe_slab(pe_full, S)

    out = positional_encoder(x, pe2d)
    out = jax.block_until_ready(out)

    ref = reference(x, pe_full)
    np.testing.assert_allclose(np.asarray(out), np.asarray(ref), rtol=1e-5, atol=1e-5)
    print("KERNEL_OK")
</pallas_src>

<mosaic_0001>
module attributes {stable_mosaic.version = 11 : i64} {
  func.func @_pe_add_kernel(%arg0: memref<2x256xf32, #tpu.memory_space<vmem>>, %arg1: memref<1x256xf32, #tpu.memory_space<vmem>>, %arg2: memref<2x256xf32, #tpu.memory_space<vmem>>) attributes {dimension_semantics = [], scalar_prefetch = 0 : i64, scratch_operands = 0 : i64, tpu.core_type = #tpu.core_type<tc>} {
    %c0 = arith.constant 0 : index
    %c0_0 = arith.constant 0 : index
    %0 = vector.load %arg0[%c0, %c0_0] : memref<2x256xf32, #tpu.memory_space<vmem>>, vector<2x256xf32>
    %cst = arith.constant 5.65685415 : f32
    %1 = vector.broadcast %cst : f32 to vector<2x256xf32>
    %2 = arith.mulf %0, %1 : vector<2x256xf32>
    %c0_1 = arith.constant 0 : index
    %c0_2 = arith.constant 0 : index
    %3 = vector.load %arg1[%c0_1, %c0_2] : memref<1x256xf32, #tpu.memory_space<vmem>>, vector<1x256xf32>
    %4 = vector.broadcast %3 : vector<1x256xf32> to vector<2x256xf32>
    %5 = arith.addf %2, %4 : vector<2x256xf32>
    %c0_3 = arith.constant 0 : index
    %c0_4 = arith.constant 0 : index
    %6 = vector.load %arg2[%c0_3, %c0_4] : memref<2x256xf32, #tpu.memory_space<vmem>>, vector<2x256xf32>
    tpu.vector_store %arg2[%c0_3, %c0_4], %5 {strides = array<i32>} : memref<2x256xf32, #tpu.memory_space<vmem>>, vector<2x256xf32>,
    return
  }
}

</mosaic_0001>

<bundles_post_ra>
// kernel: positional_encoder.1
= control target key start
LH: loop header
LB: loop body
LE: loop exit
PB: predicated region body
PF: predicated region fallthrough
CT: control target
= control target key end

     0   :  { %v15_v0 = vlaneseq  ;;  %v39_v1 = vmov 1983009808   ;;  %s64_s1 = inlined_call_operand.vmem [shape: f32[1,256], index: 1, kind: input, shape index: {}]   ;;  %s65_s0 = inlined_call_operand.vmem [shape: f32[2,256], index: 0, kind: input, shape index: {}, may-alias: {0,2}]   ;;  %s66_s2 = inlined_call_operand.vmem [shape: f32[2,256], index: 2, kind: output, shape index: {}, may-alias: {0,2}]  }
   0x1   :  { %v25_v2 = vunpack.c.l.s4 %v39_v1  ;;  %v13_v4 = vld [vmem:[%s64_s1] sm:$0x3] }
   0x2   :  { %v16_v3 = vshrl.u32 %v15_v0, 7  ;;  %v11_v8 = vld [vmem:[%s65_s0] sm:$0xf] }
   0x3   :  { %v26_v5 = vunpack.c.0.s8 %v25_v2  ;;  %v12_v12 = vmul.f32 5.656854, %v11_v8 }
   0x4   :  { %v17_v6 = vsub.s32 0, %v16_v3  ;;  %v21_v7 = vsub.s32 1, %v16_v3 }
   0x5   :  { %v29_v11 = vsub.s32 %v26_v5, %v16_v3 }
   0x6   :  { %v18_v9 = vrot.slane %v13_v4, %v17_v6  ;;  %v22_v10 = vrot.slane %v13_v4, %v21_v7 }
   0x8   :  { %v23_v13 = vcombine.low %v18_v9, %v22_v10 }
   0xa   :  { %v30_v14 = vrot.slane %v23_v13, %v29_v11 }
   0xc   :  { %v32_v15 = vadd.f32 %v30_v14, %v12_v12 }
   0xe   :  { %33 = vst [vmem:[%s66_s2] sm:$0xf] %v32_v15 }

</bundles_post_ra>
